<compile_context>
chip_gen: v5e
topology: v5e:2x2
jax: 0.10.0
libtpu: 0.0.40
codegen_flags: <defaults>
</compile_context>

<pallas_src>
import jax
import jax.numpy as jnp
from jax import lax
from jax.experimental import pallas as pl
from jax.experimental.pallas import tpu as pltpu

_LANE = 128
_SUBLANE = 8
_MIN_ELEMS = _SUBLANE * _LANE  # one (8, 128) vreg


def _round_up(a: int, b: int) -> int:
    return ((a + b - 1) // b) * b


def _device_kind() -> str:
    try:
        return jax.devices()[0].device_kind.lower()
    except Exception:  # pragma: no cover - defensive
        return ""


def _make_kernel(*, tiles_per_partial, num_tiles, tile_rows, n_valid,
                 has_tail, has_dup):
    """Kernel closure over the (static) tiling parameters."""

    def kernel(x_ref, t_ref, o_ref):
        c = pl.program_id(0)          # partial (TensorCore) index
        i = pl.program_id(1)          # tile index within this partial

        @pl.when(i == 0)
        def _init():
            o_ref[...] = jnp.zeros_like(o_ref)

        g = c * tiles_per_partial + i  # nominal global tile index

        def accumulate(mask_tail):
            x = x_ref[...].astype(jnp.float32)
            t = t_ref[...].astype(jnp.float32)
            # Stable BCE-with-logits sharing one exp + one log1p per element:
            #   sp_pos = softplus( x) = -log(1 - sigmoid(x))
            #   sp_neg = softplus(-x) = -log(sigmoid(x))
            # with relu(-x) = |x| - relu(x); clamp at 100 == PyTorch's -100
            # clamp on the log terms.
            ax = jnp.abs(x)
            rx = jnp.maximum(x, 0.0)
            l1p = jnp.log1p(jnp.exp(-ax))
            sp_pos = jnp.minimum(rx + l1p, 100.0)
            sp_neg = jnp.minimum(ax - rx + l1p, 100.0)
            loss = t * (sp_neg - sp_pos) + sp_pos
            if mask_tail:
                # Last real tile: zero contributions past the valid element
                # count (covers both wrapper zero-pad and the Pallas-padded
                # garbage rows of a partial block).
                row0 = (num_tiles - 1) * tile_rows  # static
                ridx = lax.broadcasted_iota(jnp.int32, loss.shape, 0)
                lidx = lax.broadcasted_iota(jnp.int32, loss.shape, 1)
                gidx = (row0 + ridx) * _LANE + lidx
                loss = jnp.where(gidx < n_valid, loss, 0.0)
            # Fold (tile_rows, 128) -> (8, 128) with pure VPU vreg adds and
            # accumulate directly into the VMEM-resident output block.
            o_ref[...] += loss.reshape(-1, _SUBLANE, _LANE).sum(axis=0)

        if has_tail:
            @pl.when(g < num_tiles - 1)
            def _full():
                accumulate(False)

            @pl.when(g == num_tiles - 1)
            def _tail():
                accumulate(True)
        elif has_dup:
            @pl.when(g < num_tiles)
            def _full():
                accumulate(False)
        else:
            accumulate(False)

    return kernel


def bce_loss(inp: jax.Array, target: jax.Array) -> jax.Array:
    """Equivalent of nn.Sigmoid() followed by nn.BCELoss() (mean reduction)."""
    assert inp.shape == target.shape
    n_valid = int(inp.size)
    assert n_valid > 0

    kind = _device_kind()
    # 2 partials only on multi-TensorCore parts; 1 on single-TC v5e/v6e.
    num_partials = 2 if ("v7" in kind or "v5p" in kind or "v4" in kind) else 1
    # 4 MiB blocks (8192 rows) on v6e/v7x; 2 MiB on v5e/v4 (16 MiB scoped VMEM).
    max_tile_rows = 8192 if ("v6" in kind or "v7" in kind) else 4096
    # TODO(synk): on v7x also sweep pipeline_mode=pl.Buffered(3) on the inputs.

    x = inp.reshape(-1)
    t = target.reshape(-1)

    # Pad only when the flat size cannot be viewed as (rows, 128) (or is
    # smaller than one vreg).  Padded elements are masked in-kernel, so plain
    # zeros are safe for any input dtype.  For the common multiple-of-128
    # sizes this is skipped and the reshape below is a free bitcast.
    padded = max(_round_up(n_valid, _LANE), _MIN_ELEMS)
    if padded != n_valid:
        x = jnp.pad(x, (0, padded - n_valid))
        t = jnp.pad(t, (0, padded - n_valid))

    n_rows = padded // _LANE
    tile_rows = min(max_tile_rows,
                    _round_up(pl.cdiv(n_rows, num_partials), _SUBLANE),
                    (n_rows // _SUBLANE) * _SUBLANE)
    num_tiles = pl.cdiv(n_rows, tile_rows)
    tiles_per_partial = pl.cdiv(num_tiles, num_partials)
    has_dup = num_partials * tiles_per_partial > num_tiles
    has_tail = n_valid < num_tiles * tile_rows * _LANE

    x2 = x.reshape(n_rows, _LANE)
    t2 = t.reshape(n_rows, _LANE)

    if has_dup:
        # Clamp duplicate grid points to the last real tile; their compute is
        # skipped in-kernel via pl.when(g < num_tiles).
        in_index = lambda c, i: (
            jnp.minimum(c * tiles_per_partial + i, num_tiles - 1), 0)
    else:
        in_index = lambda c, i: (c * tiles_per_partial + i, 0)
    tile_spec = pl.BlockSpec((tile_rows, _LANE), in_index)

    kernel = _make_kernel(
        tiles_per_partial=tiles_per_partial, num_tiles=num_tiles,
        tile_rows=tile_rows, n_valid=n_valid,
        has_tail=has_tail, has_dup=has_dup)

    bytes_accessed = (x2.size * x2.dtype.itemsize
                      + t2.size * t2.dtype.itemsize
                      + num_partials * _SUBLANE * _LANE * 4)

    partials = pl.pallas_call(
        kernel,
        out_shape=jax.ShapeDtypeStruct(
            (num_partials * _SUBLANE, _LANE), jnp.float32),
        grid_spec=pltpu.PrefetchScalarGridSpec(
            num_scalar_prefetch=0,
            grid=(num_partials, tiles_per_partial),
            in_specs=[tile_spec, tile_spec],
            out_specs=pl.BlockSpec((_SUBLANE, _LANE), lambda c, i: (c, 0))),
        compiler_params=pltpu.CompilerParams(
            dimension_semantics=("parallel", "arbitrary")),
        cost_estimate=pl.CostEstimate(
            flops=10 * num_tiles * tile_rows * _LANE,
            transcendentals=2 * num_tiles * tile_rows * _LANE,
            bytes_accessed=bytes_accessed),
    )(x2, t2)

    # Tiny (P*8, 128) reduction + mean normalization outside the kernel.
    return partials.sum() / jnp.float32(n_valid)


def _reference(inp, target):
    p = jax.nn.sigmoid(inp.astype(jnp.float32))
    tgt = target.astype(jnp.float32)
    log_p = jnp.maximum(jnp.log(p), -100.0)
    log_1mp = jnp.maximum(jnp.log1p(-p), -100.0)
    return jnp.mean(-(tgt * log_p + (1.0 - tgt) * log_1mp))


if __name__ == "__main__":
    key = jax.random.PRNGKey(0)
    k1, k2, k3, k4 = jax.random.split(key, 4)

    # segmentation-style logits / binary targets, NCHW (multiple-of-128 size:
    # no padding, free reshape)
    x = jax.random.normal(k1, (2, 4, 16, 16), dtype=jnp.float32)
    tgt = (jax.random.uniform(k2, (2, 4, 16, 16)) > 0.5).astype(jnp.float32)
    loss = jax.block_until_ready(bce_loss(x, tgt))
    ref = jax.block_until_ready(_reference(x, tgt))
    assert jnp.allclose(loss, ref, rtol=1e-5, atol=1e-5), (loss, ref)

    # ragged size (1155 elements): exercises the in-kernel tail mask path
    xr = jax.random.normal(k3, (3, 5, 7, 11), dtype=jnp.float32)
    tr = (jax.random.uniform(k4, (3, 5, 7, 11)) > 0.5).astype(jnp.float32)
    loss_r = jax.block_until_ready(bce_loss(xr, tr))
    ref_r = jax.block_until_ready(_reference(xr, tr))
    assert jnp.allclose(loss_r, ref_r, rtol=1e-5, atol=1e-5), (loss_r, ref_r)

    print("KERNEL_OK")
</pallas_src>

<mosaic_0001>
module attributes {stable_mosaic.version = 11 : i64} {
  func.func @kernel(%arg0: i32, %arg1: i32, %arg2: memref<16x128xf32, #tpu.memory_space<vmem>>, %arg3: memref<16x128xf32, #tpu.memory_space<vmem>>, %arg4: memref<8x128xf32, #tpu.memory_space<vmem>>) attributes {dimension_semantics = [#tpu.dimension_semantics<parallel>, #tpu.dimension_semantics<arbitrary>], iteration_bounds = array<i64: 1, 1>, scalar_prefetch = 0 : i64, scratch_operands = 0 : i64, tpu.core_type = #tpu.core_type<tc>, window_params = [{transform_indices = @transform_0, window_bounds = array<i64: 16, 128>}, {transform_indices = @transform_1, window_bounds = array<i64: 16, 128>}, {transform_indices = @transform_2, window_bounds = array<i64: 8, 128>}]} {
    %c0_i32 = arith.constant 0 : i32
    %0 = arith.cmpi eq, %arg1, %c0_i32 : i32
    %1 = arith.extui %0 : i1 to i32
    %c0_i32_0 = arith.constant 0 : i32
    %2 = arith.cmpi ne, %1, %c0_i32_0 : i32
    scf.if %2 {
      %cst_12 = arith.constant 0.000000e+00 : f32
      %27 = vector.broadcast %cst_12 : f32 to vector<8x128xf32>
      %c0_13 = arith.constant 0 : index
      %c0_14 = arith.constant 0 : index
      %28 = vector.load %arg4[%c0_13, %c0_14] : memref<8x128xf32, #tpu.memory_space<vmem>>, vector<8x128xf32>
      tpu.vector_store %arg4[%c0_13, %c0_14], %27 {strides = array<i32>} : memref<8x128xf32, #tpu.memory_space<vmem>>, vector<8x128xf32>,
    } else {
    }
    %c0 = arith.constant 0 : index
    %c0_1 = arith.constant 0 : index
    %3 = vector.load %arg2[%c0, %c0_1] : memref<16x128xf32, #tpu.memory_space<vmem>>, vector<16x128xf32>
    %c0_2 = arith.constant 0 : index
    %c0_3 = arith.constant 0 : index
    %4 = vector.load %arg3[%c0_2, %c0_3] : memref<16x128xf32, #tpu.memory_space<vmem>>, vector<16x128xf32>
    %5 = math.absf %3 : vector<16x128xf32>
    %cst = arith.constant 0.000000e+00 : f32
    %6 = vector.broadcast %cst : f32 to vector<16x128xf32>
    %7 = arith.maximumf %3, %6 : vector<16x128xf32>
    %cst_4 = arith.constant 0.000000e+00 : f32
    %8 = vector.broadcast %cst_4 : f32 to vector<16x128xf32>
    %9 = arith.subf %8, %5 : vector<16x128xf32>
    %10 = math.exp %9 : vector<16x128xf32>
    %11 = math.log1p %10 : vector<16x128xf32>
    %12 = arith.addf %7, %11 : vector<16x128xf32>
    %cst_5 = arith.constant 1.000000e+02 : f32
    %13 = vector.broadcast %cst_5 : f32 to vector<16x128xf32>
    %14 = arith.minimumf %12, %13 : vector<16x128xf32>
    %15 = arith.subf %5, %7 : vector<16x128xf32>
    %16 = arith.addf %15, %11 : vector<16x128xf32>
    %cst_6 = arith.constant 1.000000e+02 : f32
    %17 = vector.broadcast %cst_6 : f32 to vector<16x128xf32>
    %18 = arith.minimumf %16, %17 : vector<16x128xf32>
    %19 = arith.subf %18, %14 : vector<16x128xf32>
    %20 = arith.mulf %4, %19 : vector<16x128xf32>
    %21 = arith.addf %20, %14 : vector<16x128xf32>
    %c0_7 = arith.constant 0 : index
    %c0_8 = arith.constant 0 : index
    %22 = vector.load %arg4[%c0_7, %c0_8] : memref<8x128xf32, #tpu.memory_space<vmem>>, vector<8x128xf32>
    %23 = vector.shape_cast %21 : vector<16x128xf32> to vector<2x8x128xf32>
    %cst_9 = arith.constant dense<0.000000e+00> : vector<8x128xf32>
    %24 = vector.multi_reduction <add>, %23, %cst_9 [0] : vector<2x8x128xf32> to vector<8x128xf32>
    %25 = arith.addf %22, %24 : vector<8x128xf32>
    %c0_10 = arith.constant 0 : index
    %c0_11 = arith.constant 0 : index
    %26 = vector.load %arg4[%c0_10, %c0_11] : memref<8x128xf32, #tpu.memory_space<vmem>>, vector<8x128xf32>
    tpu.vector_store %arg4[%c0_10, %c0_11], %25 {strides = array<i32>} : memref<8x128xf32, #tpu.memory_space<vmem>>, vector<8x128xf32>,
    return
  }
  func.func @transform_0(%arg0: i32, %arg1: i32) -> (i32, i32) {
    %c1_i32 = arith.constant 1 : i32
    %0 = arith.muli %arg0, %c1_i32 : i32
    %1 = arith.addi %0, %arg1 : i32
    %c0_i32 = arith.constant 0 : i32
    %c0_i32_0 = arith.constant 0 : i32
    return %1, %c0_i32 : i32, i32
  }
  func.func @transform_1(%arg0: i32, %arg1: i32) -> (i32, i32) {
    %c1_i32 = arith.constant 1 : i32
    %0 = arith.muli %arg0, %c1_i32 : i32
    %1 = arith.addi %0, %arg1 : i32
    %c0_i32 = arith.constant 0 : i32
    %c0_i32_0 = arith.constant 0 : i32
    return %1, %c0_i32 : i32, i32
  }
  func.func @transform_2(%arg0: i32, %arg1: i32) -> (i32, i32) {
    %c0_i32 = arith.constant 0 : i32
    %c0_i32_0 = arith.constant 0 : i32
    return %arg0, %c0_i32 : i32, i32
  }
}

</mosaic_0001>

<bundles_post_ra>
// kernel: tpu_custom_call.1
= control target key start
LH: loop header
LB: loop body
LE: loop exit
PB: predicated region body
PF: predicated region fallthrough
CT: control target
= control target key end

     0   :  { %7 = vsyncpa [#allocation3], 0  ;;  %s252_s0 = inlined_call_operand.hbm [shape: f32[16,128], index: 0, kind: input, shape index: {}]   ;;  %s253_s1 = inlined_call_operand.hbm [shape: f32[16,128], index: 1, kind: input, shape index: {}]   ;;  %s254_s2 = inlined_call_operand.hbm [shape: f32[8,128], index: 2, kind: output, shape index: {}]  }
   0x1   :  { %8 = vsyncpa [#allocation6], 0 }
   0x2   :  { %9 = vsyncpa [#allocation4], 0  ;;  %s18_s11 = sshll.u32 %s252_s0, 4  ;;  %s223_s12 = smov [#allocation2]   ;;  %s19_s11 = int_to_ptr.hbm [resolvable:$true] %s18_s11 }
   0x3   :  { %s20_s13 = sshll.u32 %s223_s12, 4  ;;  %s35_s16 = sshll.u32 %s253_s1, 4  ;;  %s21_s13 = int_to_ptr.vmem [resolvable:$true] %s20_s13  ;;  %s36_s16 = int_to_ptr.hbm [resolvable:$true] %s35_s16 }
   0x4   :  { %s224_s17 = smov 128   ;;  %s225_s18 = smov 8  }
   0x5   :  { %26 = dma.hbm_to_vmem [thread:$0]  %s19_s11, 256, %s21_s13, [#allocation3], %s224_s17, %s224_s17, %s225_s18  }
   0x6   :  { %s226_s19 = smov [#allocation5]  }
   0x7   :  { %s37_s20 = sshll.u32 %s226_s19, 4  ;;  %s38_s20 = int_to_ptr.vmem [resolvable:$true] %s37_s20 }
   0x8   :  { %43 = dma.hbm_to_vmem [thread:$0]  %s36_s16, 256, %s38_s20, [#allocation6], %s224_s17, %s224_s17, %s225_s18  }
   0x9   :  { %217 = dma.done.wait [#allocation3], 256  }
   0xa   :  { %218 = vsyncadd [#allocation3], 4294967040 }
   0xb   :  { %219 = dma.done.wait [#allocation6], 256  }
   0xc   :  { %220 = vsyncadd [#allocation6], 4294967040  ;;  %v61_v0 = vld [vmem:[#allocation2] sm:$0xff]  ;;  %v62_v1 = vld [vmem:[#allocation2 + $0x8] sm:$0xff]  ;;  %s227_s0 = smov [#allocation7]   ;;  %s120_s23 = sshll.u32 %s254_s2, 4  ;;  %s121_s23 = int_to_ptr.hbm [resolvable:$true] %s120_s23 }
   0xd   :  { %v65_v2 = vand.u32 2147483647, %v61_v0  ;;  %v66_v3 = vand.u32 2147483647, %v62_v1  ;;  %v67_v15 = vmax.f32 %v61_v0, 0.0  ;;  %v68_v18 = vmax.f32 %v62_v1, 0.0 }
   0xe   :  { %v63_v36 = vld [vmem:[#allocation5] sm:$0xff]  ;;  %v64_v39 = vld [vmem:[#allocation5 + $0x8] sm:$0xff]  ;;  %s118_s1 = sshll.u32 %s227_s0, 4  ;;  %s119_s1 = int_to_ptr.vmem [resolvable:$true] %s118_s1 }
   0xf   :  { %v69_v4 = vsub.f32 0.0, %v65_v2  ;;  %v70_v5 = vsub.f32 0.0, %v66_v3  ;;  %v97_v23 = vsub.f32 %v65_v2, %v67_v15  ;;  %v98_v26 = vsub.f32 %v66_v3, %v68_v18 }
  0x11   :  { %v71_v6 = vmul.f32 1.442695, %v69_v4  ;;  %v73_v7 = vmul.f32 1.442695, %v70_v5 }
  0x13   :  { %137 = vpow2.f32 %v71_v6 }
  0x14   :  { %139 = vpow2.f32 %v73_v7 }
  0x19   :  { %v138_v8 = vpop.eup %137 }
  0x1a   :  { %v140_v9 = vpop.eup %139  ;;  %v75_v10 = vadd.f32 1.0, %v138_v8  ;;  %v78_v11 = vmul.f32 -0.5, %v138_v8  ;;  %v81_v16 = vand.u32 2147483647, %v138_v8 }
  0x1b   :  { %v84_v12 = vadd.f32 1.0, %v140_v9  ;;  %v87_v13 = vmul.f32 -0.5, %v140_v9  ;;  %v90_v19 = vand.u32 2147483647, %v140_v9 }
  0x1c   :  { %141 = vlog2.f32 %v75_v10  ;;  %v79_v14 = vadd.f32 1.0, %v78_v11  ;;  %vm82_vm0 = vcmp.lt.f32.partialorder %v81_v16, 0.0004427343 }
  0x1d   :  { %143 = vlog2.f32 %v84_v12  ;;  %v88_v17 = vadd.f32 1.0, %v87_v13  ;;  %vm91_vm1 = vcmp.lt.f32.partialorder %v90_v19, 0.0004427343 }
  0x1e   :  { %v80_v20 = vmul.f32 %v138_v8, %v79_v14 }
  0x1f   :  { %v89_v22 = vmul.f32 %v140_v9, %v88_v17 }
  0x22   :  { %v142_v21 = vpop.eup %141 }
  0x23   :  { %v144_v24 = vpop.eup %143  ;;  %v77_v25 = vmul.f32 0.6931472, %v142_v21 }
  0x24   :  { %v86_v27 = vmul.f32 0.6931472, %v144_v24 }
  0x25   :  { %v83_v28 = vsel %vm82_vm0, %v80_v20, %v77_v25 }
  0x26   :  { %v92_v29 = vsel %vm91_vm1, %v89_v22, %v86_v27  ;;  %v93_v30 = vadd.f32 %v83_v28, %v67_v15  ;;  %v99_v31 = vadd.f32 %v97_v23, %v83_v28 }
  0x27   :  { %v94_v32 = vadd.f32 %v92_v29, %v68_v18  ;;  %v100_v33 = vadd.f32 %v98_v26, %v92_v29 }
  0x28   :  { %v95_v34 = vmin.f32 %v93_v30, 100.0  ;;  %v101_v35 = vmin.f32 %v99_v31, 100.0 }
  0x29   :  { %v96_v37 = vmin.f32 %v94_v32, 100.0  ;;  %v102_v38 = vmin.f32 %v100_v33, 100.0 }
  0x2a   :  { %v103_v40 = vsub.f32 %v101_v35, %v95_v34 }
  0x2b   :  { %v104_v41 = vsub.f32 %v102_v38, %v96_v37 }
  0x2c   :  { %v105_v42 = vmul.f32 %v103_v40, %v63_v36 }
  0x2d   :  { %v106_v43 = vmul.f32 %v104_v41, %v64_v39 }
  0x2e   :  { %v107_v44 = vadd.f32 %v105_v42, %v95_v34 }
  0x2f   :  { %v108_v45 = vadd.f32 %v106_v43, %v96_v37 }
  0x31   :  { %v110_v46 = vadd.f32 %v108_v45, %v107_v44 }
  0x33   :  { %112 = vst [vmem:[#allocation7] sm:$0xff] %v110_v46 }
  0x34   :  { %123 = dma.vmem_to_hbm [thread:$0]  %s119_s1, 128, %s121_s23, [#allocation4]  }
  0x35   :  { %221 = dma.done.wait [#allocation4], 128  }
  0x36   :  { %222 = vsyncadd [#allocation4], 4294967168 }
  0x37   :  { %128 = vsyncpa [#allocation3], 1 }
  0x38   :  { %129 = vsyncpa [#allocation6], 1 }
  0x39   :  { %130 = vsyncpa [#allocation4], 1 }

</bundles_post_ra>
